<compile_context>
chip_gen: v6e
topology: v6e:2x2x1
jax: 0.10.0
libtpu: 0.0.40
codegen_flags: <defaults>
</compile_context>

<pallas_src>
import math

import jax
import jax.numpy as jnp
from jax.experimental import pallas as pl
from jax.experimental.pallas import tpu as pltpu

# ---------------------------------------------------------------------------
# config (small, deterministic)
# ---------------------------------------------------------------------------
CFG = dict(
    emb_dim=32,
    context_length=8,
    n_heads=4,
    drop_out=0.1,      # TODO(synk): dropout is identity here (eval mode)
    qkv_bias=False,
)
BATCH = 2
SEQ = CFG["context_length"]
D = CFG["emb_dim"]
NH = CFG["n_heads"]
HD = D // NH
FF = 4 * D
EPS = 1e-5

# rows of the packed (6, D) parameter-vector array
G1, S1, G2, S2, BO, BF2 = range(6)


# ---------------------------------------------------------------------------
# in-kernel helpers
# ---------------------------------------------------------------------------
def _layernorm(x, gamma, beta):
    mean = jnp.mean(x, axis=-1, keepdims=True)
    var = jnp.mean((x - mean) ** 2, axis=-1, keepdims=True)   # unbiased=False
    # rsqrt goes to the EUP slot instead of a VALU divide.
    return (x - mean) * jax.lax.rsqrt(var + EPS) * gamma + beta


def _gelu_tanh(x):
    # GELU with tanh approximation (as in the reference FeedForward module)
    return 0.5 * x * (1.0 + jnp.tanh(
        jnp.sqrt(2.0 / jnp.pi) * (x + 0.044715 * x ** 3)))


# ---------------------------------------------------------------------------
# Pallas kernel: one grid step = one batch element, weights resident in VMEM
# ---------------------------------------------------------------------------
def transformer_kernel(x_ref, wqkv_ref, wo_ref, pvec_ref,
                       w1_ref, bf1_ref, w2_ref, out_ref):
    x = x_ref[...].astype(jnp.float32)                       # (T, D)
    T, Dm = x.shape

    # packed per-feature vectors (static row views — free)
    g1 = pvec_ref[G1:G1 + 1, :]
    s1 = pvec_ref[S1:S1 + 1, :]
    g2 = pvec_ref[G2:G2 + 1, :]
    s2 = pvec_ref[S2:S2 + 1, :]
    bo = pvec_ref[BO:BO + 1, :]
    bf2 = pvec_ref[BF2:BF2 + 1, :]

    # ---- LayerNorm 1 ----
    xn = _layernorm(x, g1, s1)

    # ---- fused QKV projection: single 2D matmul, K = D = 32 ----
    qkv = jnp.dot(xn, wqkv_ref[...],
                  preferred_element_type=jnp.float32)        # (T, 3D)
    scale = 1.0 / math.sqrt(HD)
    q = jnp.stack([qkv[:, h * HD:(h + 1) * HD]
                   for h in range(NH)], axis=0) * scale       # (NH, T, HD)
    k = jnp.stack([qkv[:, Dm + h * HD:Dm + (h + 1) * HD]
                   for h in range(NH)], axis=0)
    v = jnp.stack([qkv[:, 2 * Dm + h * HD:2 * Dm + (h + 1) * HD]
                   for h in range(NH)], axis=0)

    # ---- causal mask generated in-kernel (no HBM input / DMA for it) ----
    row = jax.lax.broadcasted_iota(jnp.int32, (T, T), 0)
    col = jax.lax.broadcasted_iota(jnp.int32, (T, T), 1)
    bias = jnp.where(col <= row, 0.0, -1e30).astype(jnp.float32)

    # ---- per-head attention (head-batched, like the flash reference) ----
    scores = jnp.einsum("hqd,hkd->hqk", q, k,
                        preferred_element_type=jnp.float32)  # (NH, T, T)
    scores = scores + bias[None, :, :]
    m = jnp.max(scores, axis=-1, keepdims=True)
    e = jnp.exp(scores - m)
    p = e / jnp.sum(e, axis=-1, keepdims=True)               # exact division
    ctx = jnp.einsum("hqk,hkd->hqd", p, v,
                     preferred_element_type=jnp.float32)     # (NH, T, HD)

    # ---- output projection: single matmul with K = NH*HD = 32 ----
    ctx2d = jnp.concatenate([ctx[h] for h in range(NH)], axis=1)   # (T, D)
    attn_out = jnp.dot(ctx2d, wo_ref[...],
                       preferred_element_type=jnp.float32) + bo

    out1 = x + attn_out                                      # residual 1

    # ---- LayerNorm 2 + FeedForward ----
    xn2 = _layernorm(out1, g2, s2)
    h1 = jnp.dot(xn2, w1_ref[...],
                 preferred_element_type=jnp.float32) + bf1_ref[...]
    h1 = _gelu_tanh(h1)
    ff_out = jnp.dot(h1, w2_ref[...],
                     preferred_element_type=jnp.float32) + bf2

    out_ref[...] = (out1 + ff_out).astype(out_ref.dtype)     # residual 2


# ---------------------------------------------------------------------------
# jitted wrapper: weight fusion constant-folds, single pallas_call over batch
# ---------------------------------------------------------------------------
@jax.jit
def transformer_block(x, params):
    B, T, Dm = x.shape

    # fuse Q/K/V weights into one (D, 3D) matrix and pack the (1, D) vectors
    wqkv = jnp.concatenate([params["wq"], params["wk"], params["wv"]], axis=1)
    pvec = jnp.concatenate([params["g1"], params["s1"],
                            params["g2"], params["s2"],
                            params["bo"], params["bf2"]], axis=0)   # (6, D)

    return pl.pallas_call(
        transformer_kernel,
        out_shape=jax.ShapeDtypeStruct((B, T, Dm), x.dtype),
        grid=(B,),
        in_specs=[
            pl.BlockSpec((None, T, Dm), lambda b: (b, 0, 0)),   # x (per-batch)
            pl.BlockSpec((Dm, 3 * Dm), lambda b: (0, 0)),       # wqkv (resident)
            pl.BlockSpec((Dm, Dm), lambda b: (0, 0)),           # wo   (resident)
            pl.BlockSpec((6, Dm), lambda b: (0, 0)),            # packed vectors
            pl.BlockSpec((Dm, FF), lambda b: (0, 0)),           # w1
            pl.BlockSpec((1, FF), lambda b: (0, 0)),            # bf1
            pl.BlockSpec((FF, Dm), lambda b: (0, 0)),           # w2
        ],
        out_specs=pl.BlockSpec((None, T, Dm), lambda b: (b, 0, 0)),
        compiler_params=pltpu.CompilerParams(
            dimension_semantics=("parallel",)),
    )(x, wqkv, params["wo"], pvec, params["w1"], params["bf1"], params["w2"])


# ---------------------------------------------------------------------------
# pure-JAX reference (for a correctness check)
# ---------------------------------------------------------------------------
def reference(x, p):
    def ln(v, g, b):
        m = jnp.mean(v, -1, keepdims=True)
        var = jnp.mean((v - m) ** 2, -1, keepdims=True)
        return (v - m) / jnp.sqrt(var + EPS) * g + b

    xn = ln(x, p["g1"][0], p["s1"][0])
    q = xn @ p["wq"]; k = xn @ p["wk"]; v = xn @ p["wv"]
    B, T, _ = x.shape
    q = q.reshape(B, T, NH, HD).transpose(0, 2, 1, 3)
    k = k.reshape(B, T, NH, HD).transpose(0, 2, 1, 3)
    v = v.reshape(B, T, NH, HD).transpose(0, 2, 1, 3)
    scores = jnp.einsum("bhqd,bhkd->bhqk", q, k) / math.sqrt(HD)
    mask = jnp.tril(jnp.ones((T, T), bool))
    scores = jnp.where(mask, scores, -1e30)
    attn = jax.nn.softmax(scores, axis=-1)
    ctx = jnp.einsum("bhqk,bhkd->bhqd", attn, v).transpose(0, 2, 1, 3).reshape(B, T, D)
    attn_out = ctx @ p["wo"] + p["bo"][0]
    out1 = x + attn_out
    xn2 = ln(out1, p["g2"][0], p["s2"][0])
    h1 = xn2 @ p["w1"] + p["bf1"][0]
    h1 = 0.5 * h1 * (1 + jnp.tanh(jnp.sqrt(2 / jnp.pi) * (h1 + 0.044715 * h1 ** 3)))
    ff = h1 @ p["w2"] + p["bf2"][0]
    return out1 + ff


# ---------------------------------------------------------------------------
# main
# ---------------------------------------------------------------------------
if __name__ == "__main__":
    key = jax.random.PRNGKey(0)
    keys = jax.random.split(key, 16)

    def init_w(k, shape, scale=0.02):
        return (scale * jax.random.normal(k, shape)).astype(jnp.float32)

    params = dict(
        wq=init_w(keys[0], (D, D)),
        wk=init_w(keys[1], (D, D)),
        wv=init_w(keys[2], (D, D)),
        wo=init_w(keys[3], (D, D)),
        bo=init_w(keys[4], (1, D)),
        g1=jnp.ones((1, D), jnp.float32),
        s1=jnp.zeros((1, D), jnp.float32),
        g2=jnp.ones((1, D), jnp.float32),
        s2=jnp.zeros((1, D), jnp.float32),
        w1=init_w(keys[5], (D, FF)),
        bf1=init_w(keys[6], (1, FF)),
        w2=init_w(keys[7], (FF, D)),
        bf2=init_w(keys[8], (1, D)),
    )

    x = jax.random.normal(keys[9], (BATCH, SEQ, D), dtype=jnp.float32)

    out = transformer_block(x, params)
    out = jax.block_until_ready(out)

    ref = reference(x, params)
    assert out.shape == (BATCH, SEQ, D)
    assert jnp.allclose(out, ref, atol=1e-4, rtol=1e-4), (
        float(jnp.max(jnp.abs(out - ref))))

    print("KERNEL_OK")
</pallas_src>

<mosaic_0001>
module attributes {stable_mosaic.version = 11 : i64} {
  func.func @transformer_kernel(%arg0: i32, %arg1: memref<1x8x32xf32, #tpu.memory_space<vmem>>, %arg2: memref<32x96xf32, #tpu.memory_space<vmem>>, %arg3: memref<32x32xf32, #tpu.memory_space<vmem>>, %arg4: memref<6x32xf32, #tpu.memory_space<vmem>>, %arg5: memref<32x128xf32, #tpu.memory_space<vmem>>, %arg6: memref<1x128xf32, #tpu.memory_space<vmem>>, %arg7: memref<128x32xf32, #tpu.memory_space<vmem>>, %arg8: memref<1x8x32xf32, #tpu.memory_space<vmem>>) attributes {dimension_semantics = [#tpu.dimension_semantics<parallel>], iteration_bounds = array<i64: 2>, scalar_prefetch = 0 : i64, scratch_operands = 0 : i64, tpu.core_type = #tpu.core_type<tc>, window_params = [{transform_indices = @transform_0, window_bounds = array<i64: 1, 8, 32>}, {pipeline_mode = #tpu.pipeline_mode<synchronous>, transform_indices = @transform_1, window_bounds = array<i64: 32, 96>}, {pipeline_mode = #tpu.pipeline_mode<synchronous>, transform_indices = @transform_2, window_bounds = array<i64: 32, 32>}, {pipeline_mode = #tpu.pipeline_mode<synchronous>, transform_indices = @transform_3, window_bounds = array<i64: 6, 32>}, {pipeline_mode = #tpu.pipeline_mode<synchronous>, transform_indices = @transform_4, window_bounds = array<i64: 32, 128>}, {pipeline_mode = #tpu.pipeline_mode<synchronous>, transform_indices = @transform_5, window_bounds = array<i64: 1, 128>}, {pipeline_mode = #tpu.pipeline_mode<synchronous>, transform_indices = @transform_6, window_bounds = array<i64: 128, 32>}, {transform_indices = @transform_7, window_bounds = array<i64: 1, 8, 32>}]} {
    %c0 = arith.constant 0 : index
    %c0_0 = arith.constant 0 : index
    %c0_1 = arith.constant 0 : index
    %0 = vector.load %arg1[%c0, %c0_0, %c0_1] : memref<1x8x32xf32, #tpu.memory_space<vmem>>, vector<1x8x32xf32>
    %1 = vector.shape_cast %0 : vector<1x8x32xf32> to vector<8x32xf32>
    %c0_2 = arith.constant 0 : index
    %c0_3 = arith.constant 0 : index
    %2 = vector.load %arg4[%c0_2, %c0_3] : memref<6x32xf32, #tpu.memory_space<vmem>>, vector<1x32xf32>
    %c1 = arith.constant 1 : index
    %c0_4 = arith.constant 0 : index
    %3 = vector.load %arg4[%c1, %c0_4] : memref<6x32xf32, #tpu.memory_space<vmem>>, vector<1x32xf32>
    %c2 = arith.constant 2 : index
    %c0_5 = arith.constant 0 : index
    %4 = vector.load %arg4[%c2, %c0_5] : memref<6x32xf32, #tpu.memory_space<vmem>>, vector<1x32xf32>
    %c3 = arith.constant 3 : index
    %c0_6 = arith.constant 0 : index
    %5 = vector.load %arg4[%c3, %c0_6] : memref<6x32xf32, #tpu.memory_space<vmem>>, vector<1x32xf32>
    %c4 = arith.constant 4 : index
    %c0_7 = arith.constant 0 : index
    %6 = vector.load %arg4[%c4, %c0_7] : memref<6x32xf32, #tpu.memory_space<vmem>>, vector<1x32xf32>
    %c5 = arith.constant 5 : index
    %c0_8 = arith.constant 0 : index
    %7 = vector.load %arg4[%c5, %c0_8] : memref<6x32xf32, #tpu.memory_space<vmem>>, vector<1x32xf32>
    %cst = arith.constant dense<0.000000e+00> : vector<8xf32>
    %8 = vector.multi_reduction <add>, %1, %cst [1] : vector<8x32xf32> to vector<8xf32>
    %9 = vector.shape_cast %8 : vector<8xf32> to vector<8x1xf32>
    %cst_9 = arith.constant 3.200000e+01 : f32
    %10 = vector.broadcast %cst_9 : f32 to vector<8x1xf32>
    %11 = arith.divf %9, %10 : vector<8x1xf32>
    %12 = vector.broadcast %11 : vector<8x1xf32> to vector<8x32xf32>
    %13 = arith.subf %1, %12 : vector<8x32xf32>
    %14 = arith.mulf %13, %13 : vector<8x32xf32>
    %cst_10 = arith.constant dense<0.000000e+00> : vector<8xf32>
    %15 = vector.multi_reduction <add>, %14, %cst_10 [1] : vector<8x32xf32> to vector<8xf32>
    %16 = vector.shape_cast %15 : vector<8xf32> to vector<8x1xf32>
    %cst_11 = arith.constant 3.200000e+01 : f32
    %17 = vector.broadcast %cst_11 : f32 to vector<8x1xf32>
    %18 = arith.divf %16, %17 : vector<8x1xf32>
    %19 = vector.broadcast %11 : vector<8x1xf32> to vector<8x32xf32>
    %20 = arith.subf %1, %19 : vector<8x32xf32>
    %cst_12 = arith.constant 9.99999974E-6 : f32
    %21 = vector.broadcast %cst_12 : f32 to vector<8x1xf32>
    %22 = arith.addf %18, %21 : vector<8x1xf32>
    %23 = math.rsqrt %22 : vector<8x1xf32>
    %24 = vector.broadcast %23 : vector<8x1xf32> to vector<8x32xf32>
    %25 = arith.mulf %20, %24 : vector<8x32xf32>
    %26 = vector.broadcast %2 : vector<1x32xf32> to vector<8x32xf32>
    %27 = arith.mulf %25, %26 : vector<8x32xf32>
    %28 = vector.broadcast %3 : vector<1x32xf32> to vector<8x32xf32>
    %29 = arith.addf %27, %28 : vector<8x32xf32>
    %c0_13 = arith.constant 0 : index
    %c0_14 = arith.constant 0 : index
    %30 = vector.load %arg2[%c0_13, %c0_14] : memref<32x96xf32, #tpu.memory_space<vmem>>, vector<32x96xf32>
    %cst_15 = arith.constant dense<0.000000e+00> : vector<8x96xf32>
    %31 = tpu.matmul %29, %30, %cst_15 {dimension_numbers = #tpu.dot_dimension_numbers<[1], [0], [0], [1], [0, 0, 1, 1], [], []>} : vector<8x32xf32>, vector<32x96xf32>, vector<8x96xf32> -> vector<8x96xf32>
    %32 = vector.extract_strided_slice %31 {offsets = [0, 0], sizes = [8, 8], strides = [1, 1]} : vector<8x96xf32> to vector<8x8xf32>
    %33 = vector.extract_strided_slice %31 {offsets = [0, 8], sizes = [8, 8], strides = [1, 1]} : vector<8x96xf32> to vector<8x8xf32>
    %34 = vector.extract_strided_slice %31 {offsets = [0, 16], sizes = [8, 8], strides = [1, 1]} : vector<8x96xf32> to vector<8x8xf32>
    %35 = vector.extract_strided_slice %31 {offsets = [0, 24], sizes = [8, 8], strides = [1, 1]} : vector<8x96xf32> to vector<8x8xf32>
    %36 = vector.shape_cast %32 : vector<8x8xf32> to vector<1x8x8xf32>
    %37 = vector.shape_cast %33 : vector<8x8xf32> to vector<1x8x8xf32>
    %38 = vector.shape_cast %34 : vector<8x8xf32> to vector<1x8x8xf32>
    %39 = vector.shape_cast %35 : vector<8x8xf32> to vector<1x8x8xf32>
    %40 = tpu.concatenate %36, %37, %38, %39 in 0 : vector<1x8x8xf32>, vector<1x8x8xf32>, vector<1x8x8xf32>, vector<1x8x8xf32> -> vector<4x8x8xf32>
    %cst_16 = arith.constant 0.353553385 : f32
    %41 = vector.broadcast %cst_16 : f32 to vector<4x8x8xf32>
    %42 = arith.mulf %40, %41 : vector<4x8x8xf32>
    %43 = vector.extract_strided_slice %31 {offsets = [0, 32], sizes = [8, 8], strides = [1, 1]} : vector<8x96xf32> to vector<8x8xf32>
    %44 = vector.extract_strided_slice %31 {offsets = [0, 40], sizes = [8, 8], strides = [1, 1]} : vector<8x96xf32> to vector<8x8xf32>
    %45 = vector.extract_strided_slice %31 {offsets = [0, 48], sizes = [8, 8], strides = [1, 1]} : vector<8x96xf32> to vector<8x8xf32>
    %46 = vector.extract_strided_slice %31 {offsets = [0, 56], sizes = [8, 8], strides = [1, 1]} : vector<8x96xf32> to vector<8x8xf32>
    %47 = vector.shape_cast %43 : vector<8x8xf32> to vector<1x8x8xf32>
    %48 = vector.shape_cast %44 : vector<8x8xf32> to vector<1x8x8xf32>
    %49 = vector.shape_cast %45 : vector<8x8xf32> to vector<1x8x8xf32>
    %50 = vector.shape_cast %46 : vector<8x8xf32> to vector<1x8x8xf32>
    %51 = tpu.concatenate %47, %48, %49, %50 in 0 : vector<1x8x8xf32>, vector<1x8x8xf32>, vector<1x8x8xf32>, vector<1x8x8xf32> -> vector<4x8x8xf32>
    %52 = vector.extract_strided_slice %31 {offsets = [0, 64], sizes = [8, 8], strides = [1, 1]} : vector<8x96xf32> to vector<8x8xf32>
    %53 = vector.extract_strided_slice %31 {offsets = [0, 72], sizes = [8, 8], strides = [1, 1]} : vector<8x96xf32> to vector<8x8xf32>
    %54 = vector.extract_strided_slice %31 {offsets = [0, 80], sizes = [8, 8], strides = [1, 1]} : vector<8x96xf32> to vector<8x8xf32>
    %55 = vector.extract_strided_slice %31 {offsets = [0, 88], sizes = [8, 8], strides = [1, 1]} : vector<8x96xf32> to vector<8x8xf32>
    %56 = vector.shape_cast %52 : vector<8x8xf32> to vector<1x8x8xf32>
    %57 = vector.shape_cast %53 : vector<8x8xf32> to vector<1x8x8xf32>
    %58 = vector.shape_cast %54 : vector<8x8xf32> to vector<1x8x8xf32>
    %59 = vector.shape_cast %55 : vector<8x8xf32> to vector<1x8x8xf32>
    %60 = tpu.concatenate %56, %57, %58, %59 in 0 : vector<1x8x8xf32>, vector<1x8x8xf32>, vector<1x8x8xf32>, vector<1x8x8xf32> -> vector<4x8x8xf32>
    %61 = tpu.iota {dimensions = array<i32: 0>} : vector<8x8xi32>
    %62 = tpu.iota {dimensions = array<i32: 1>} : vector<8x8xi32>
    %63 = arith.cmpi sle, %62, %61 : vector<8x8xi32>
    %cst_17 = arith.constant 0.000000e+00 : f32
    %cst_18 = arith.constant -1.000000e+30 : f32
    %64 = vector.broadcast %cst_17 : f32 to vector<8x8xf32>
    %65 = vector.broadcast %cst_18 : f32 to vector<8x8xf32>
    %66 = arith.select %63, %64, %65 : vector<8x8xi1>, vector<8x8xf32>
    "tpu.trace_start"() <{level = 10 : i32, message = "hqd,hkd->hqk"}> : () -> ()
    %cst_19 = arith.constant dense<0.000000e+00> : vector<4x8x8xf32>
    %67 = tpu.matmul %42, %51, %cst_19 {dimension_numbers = #tpu.dot_dimension_numbers<[2], [2], [1], [1], [0, 0, 0, 1, 1, 1], [0], [0]>} : vector<4x8x8xf32>, vector<4x8x8xf32>, vector<4x8x8xf32> -> vector<4x8x8xf32>
    "tpu.trace_stop"() : () -> ()
    %68 = vector.shape_cast %66 : vector<8x8xf32> to vector<1x8x8xf32>
    %69 = vector.broadcast %68 : vector<1x8x8xf32> to vector<4x8x8xf32>
    %70 = arith.addf %67, %69 : vector<4x8x8xf32>
    %cst_20 = arith.constant dense<0xFF800000> : vector<4x8xf32>
    %71 = vector.multi_reduction <maximumf>, %70, %cst_20 [2] : vector<4x8x8xf32> to vector<4x8xf32>
    %72 = vector.shape_cast %71 : vector<4x8xf32> to vector<4x8x1xf32>
    %73 = vector.broadcast %72 : vector<4x8x1xf32> to vector<4x8x8xf32>
    %74 = arith.subf %70, %73 : vector<4x8x8xf32>
    %75 = math.exp %74 : vector<4x8x8xf32>
    %cst_21 = arith.constant dense<0.000000e+00> : vector<4x8xf32>
    %76 = vector.multi_reduction <add>, %75, %cst_21 [2] : vector<4x8x8xf32> to vector<4x8xf32>
    %77 = vector.shape_cast %76 : vector<4x8xf32> to vector<4x8x1xf32>
    %78 = vector.broadcast %77 : vector<4x8x1xf32> to vector<4x8x8xf32>
    %79 = arith.divf %75, %78 : vector<4x8x8xf32>
    "tpu.trace_start"() <{level = 10 : i32, message = "hqk,hkd->hqd"}> : () -> ()
    %cst_22 = arith.constant dense<0.000000e+00> : vector<4x8x8xf32>
    %80 = tpu.matmul %79, %60, %cst_22 {dimension_numbers = #tpu.dot_dimension_numbers<[2], [1], [1], [2], [0, 0, 0, 1, 1, 2], [0], [0]>} : vector<4x8x8xf32>, vector<4x8x8xf32>, vector<4x8x8xf32> -> vector<4x8x8xf32>
    "tpu.trace_stop"() : () -> ()
    %81 = vector.extract_strided_slice %80 {offsets = [0, 0, 0], sizes = [1, 8, 8], strides = [1, 1, 1]} : vector<4x8x8xf32> to vector<1x8x8xf32>
    %82 = vector.shape_cast %81 : vector<1x8x8xf32> to vector<8x8xf32>
    %83 = vector.extract_strided_slice %80 {offsets = [1, 0, 0], sizes = [1, 8, 8], strides = [1, 1, 1]} : vector<4x8x8xf32> to vector<1x8x8xf32>
    %84 = vector.shape_cast %83 : vector<1x8x8xf32> to vector<8x8xf32>
    %85 = vector.extract_strided_slice %80 {offsets = [2, 0, 0], sizes = [1, 8, 8], strides = [1, 1, 1]} : vector<4x8x8xf32> to vector<1x8x8xf32>
    %86 = vector.shape_cast %85 : vector<1x8x8xf32> to vector<8x8xf32>
    %87 = vector.extract_strided_slice %80 {offsets = [3, 0, 0], sizes = [1, 8, 8], strides = [1, 1, 1]} : vector<4x8x8xf32> to vector<1x8x8xf32>
    %88 = vector.shape_cast %87 : vector<1x8x8xf32> to vector<8x8xf32>
    %89 = tpu.concatenate %82, %84, %86, %88 in 1 : vector<8x8xf32>, vector<8x8xf32>, vector<8x8xf32>, vector<8x8xf32> -> vector<8x32xf32>
    %c0_23 = arith.constant 0 : index
    %c0_24 = arith.constant 0 : index
    %90 = vector.load %arg3[%c0_23, %c0_24] : memref<32x32xf32, #tpu.memory_space<vmem>>, vector<32x32xf32>
    %cst_25 = arith.constant dense<0.000000e+00> : vector<8x32xf32>
    %91 = tpu.matmul %89, %90, %cst_25 {dimension_numbers = #tpu.dot_dimension_numbers<[1], [0], [0], [1], [0, 0, 1, 1], [], []>} : vector<8x32xf32>, vector<32x32xf32>, vector<8x32xf32> -> vector<8x32xf32>
    %92 = vector.broadcast %6 : vector<1x32xf32> to vector<8x32xf32>
    %93 = arith.addf %91, %92 : vector<8x32xf32>
    %94 = arith.addf %1, %93 : vector<8x32xf32>
    %cst_26 = arith.constant dense<0.000000e+00> : vector<8xf32>
    %95 = vector.multi_reduction <add>, %94, %cst_26 [1] : vector<8x32xf32> to vector<8xf32>
    %96 = vector.shape_cast %95 : vector<8xf32> to vector<8x1xf32>
    %cst_27 = arith.constant 3.200000e+01 : f32
    %97 = vector.broadcast %cst_27 : f32 to vector<8x1xf32>
    %98 = arith.divf %96, %97 : vector<8x1xf32>
    %99 = vector.broadcast %98 : vector<8x1xf32> to vector<8x32xf32>
    %100 = arith.subf %94, %99 : vector<8x32xf32>
    %101 = arith.mulf %100, %100 : vector<8x32xf32>
    %cst_28 = arith.constant dense<0.000000e+00> : vector<8xf32>
    %102 = vector.multi_reduction <add>, %101, %cst_28 [1] : vector<8x32xf32> to vector<8xf32>
    %103 = vector.shape_cast %102 : vector<8xf32> to vector<8x1xf32>
    %cst_29 = arith.constant 3.200000e+01 : f32
    %104 = vector.broadcast %cst_29 : f32 to vector<8x1xf32>
    %105 = arith.divf %103, %104 : vector<8x1xf32>
    %106 = vector.broadcast %98 : vector<8x1xf32> to vector<8x32xf32>
    %107 = arith.subf %94, %106 : vector<8x32xf32>
    %cst_30 = arith.constant 9.99999974E-6 : f32
    %108 = vector.broadcast %cst_30 : f32 to vector<8x1xf32>
    %109 = arith.addf %105, %108 : vector<8x1xf32>
    %110 = math.rsqrt %109 : vector<8x1xf32>
    %111 = vector.broadcast %110 : vector<8x1xf32> to vector<8x32xf32>
    %112 = arith.mulf %107, %111 : vector<8x32xf32>
    %113 = vector.broadcast %4 : vector<1x32xf32> to vector<8x32xf32>
    %114 = arith.mulf %112, %113 : vector<8x32xf32>
    %115 = vector.broadcast %5 : vector<1x32xf32> to vector<8x32xf32>
    %116 = arith.addf %114, %115 : vector<8x32xf32>
    %c0_31 = arith.constant 0 : index
    %c0_32 = arith.constant 0 : index
    %117 = vector.load %arg5[%c0_31, %c0_32] : memref<32x128xf32, #tpu.memory_space<vmem>>, vector<32x128xf32>
    %cst_33 = arith.constant dense<0.000000e+00> : vector<8x128xf32>
    %118 = tpu.matmul %116, %117, %cst_33 {dimension_numbers = #tpu.dot_dimension_numbers<[1], [0], [0], [1], [0, 0, 1, 1], [], []>} : vector<8x32xf32>, vector<32x128xf32>, vector<8x128xf32> -> vector<8x128xf32>
    %c0_34 = arith.constant 0 : index
    %c0_35 = arith.constant 0 : index
    %119 = vector.load %arg6[%c0_34, %c0_35] : memref<1x128xf32, #tpu.memory_space<vmem>>, vector<1x128xf32>
    %120 = vector.broadcast %119 : vector<1x128xf32> to vector<8x128xf32>
    %121 = arith.addf %118, %120 : vector<8x128xf32>
    %cst_36 = arith.constant 5.000000e-01 : f32
    %122 = vector.broadcast %cst_36 : f32 to vector<8x128xf32>
    %123 = arith.mulf %122, %121 : vector<8x128xf32>
    %cst_37 = arith.constant 0.636619746 : f32
    %124 = math.sqrt %cst_37 : f32
    %125 = arith.mulf %121, %121 : vector<8x128xf32>
    %126 = arith.mulf %121, %125 : vector<8x128xf32>
    %cst_38 = arith.constant 4.471500e-02 : f32
    %127 = vector.broadcast %cst_38 : f32 to vector<8x128xf32>
    %128 = arith.mulf %127, %126 : vector<8x128xf32>
    %129 = arith.addf %121, %128 : vector<8x128xf32>
    %130 = vector.broadcast %124 : f32 to vector<8x128xf32>
    %131 = arith.mulf %130, %129 : vector<8x128xf32>
    %132 = math.tanh %131 : vector<8x128xf32>
    %cst_39 = arith.constant 1.000000e+00 : f32
    %133 = vector.broadcast %cst_39 : f32 to vector<8x128xf32>
    %134 = arith.addf %133, %132 : vector<8x128xf32>
    %135 = arith.mulf %123, %134 : vector<8x128xf32>
    %c0_40 = arith.constant 0 : index
    %c0_41 = arith.constant 0 : index
    %136 = vector.load %arg7[%c0_40, %c0_41] : memref<128x32xf32, #tpu.memory_space<vmem>>, vector<128x32xf32>
    %cst_42 = arith.constant dense<0.000000e+00> : vector<8x32xf32>
    %137 = tpu.matmul %135, %136, %cst_42 {dimension_numbers = #tpu.dot_dimension_numbers<[1], [0], [0], [1], [0, 0, 1, 1], [], []>} : vector<8x128xf32>, vector<128x32xf32>, vector<8x32xf32> -> vector<8x32xf32>
    %138 = vector.broadcast %7 : vector<1x32xf32> to vector<8x32xf32>
    %139 = arith.addf %137, %138 : vector<8x32xf32>
    %140 = arith.addf %94, %139 : vector<8x32xf32>
    %c0_43 = arith.constant 0 : index
    %c0_44 = arith.constant 0 : index
    %c0_45 = arith.constant 0 : index
    %141 = vector.load %arg8[%c0_43, %c0_44, %c0_45] : memref<1x8x32xf32, #tpu.memory_space<vmem>>, vector<1x8x32xf32>
    %142 = vector.shape_cast %141 : vector<1x8x32xf32> to vector<8x32xf32>
    %143 = vector.shape_cast %140 : vector<8x32xf32> to vector<1x8x32xf32>
    tpu.vector_store %arg8[%c0_43, %c0_44, %c0_45], %143 {strides = array<i32>} : memref<1x8x32xf32, #tpu.memory_space<vmem>>, vector<1x8x32xf32>,
    return
  }
  func.func @transform_0(%arg0: i32) -> (i32, i32, i32) {
    %c0_i32 = arith.constant 0 : i32
    %c0_i32_0 = arith.constant 0 : i32
    %c0_i32_1 = arith.constant 0 : i32
    return %arg0, %c0_i32, %c0_i32_0 : i32, i32, i32
  }
  func.func @transform_1(%arg0: i32) -> (i32, i32) {
    %c0_i32 = arith.constant 0 : i32
    %c0_i32_0 = arith.constant 0 : i32
    %c0_i32_1 = arith.constant 0 : i32
    return %c0_i32, %c0_i32_0 : i32, i32
  }
  func.func @transform_2(%arg0: i32) -> (i32, i32) {
    %c0_i32 = arith.constant 0 : i32
    %c0_i32_0 = arith.constant 0 : i32
    %c0_i32_1 = arith.constant 0 : i32
    return %c0_i32, %c0_i32_0 : i32, i32
  }
  func.func @transform_3(%arg0: i32) -> (i32, i32) {
    %c0_i32 = arith.constant 0 : i32
    %c0_i32_0 = arith.constant 0 : i32
    %c0_i32_1 = arith.constant 0 : i32
    return %c0_i32, %c0_i32_0 : i32, i32
  }
  func.func @transform_4(%arg0: i32) -> (i32, i32) {
    %c0_i32 = arith.constant 0 : i32
    %c0_i32_0 = arith.constant 0 : i32
    %c0_i32_1 = arith.constant 0 : i32
    return %c0_i32, %c0_i32_0 : i32, i32
  }
  func.func @transform_5(%arg0: i32) -> (i32, i32) {
    %c0_i32 = arith.constant 0 : i32
    %c0_i32_0 = arith.constant 0 : i32
    %c0_i32_1 = arith.constant 0 : i32
    return %c0_i32, %c0_i32_0 : i32, i32
  }
  func.func @transform_6(%arg0: i32) -> (i32, i32) {
    %c0_i32 = arith.constant 0 : i32
    %c0_i32_0 = arith.constant 0 : i32
    %c0_i32_1 = arith.constant 0 : i32
    return %c0_i32, %c0_i32_0 : i32, i32
  }
  func.func @transform_7(%arg0: i32) -> (i32, i32, i32) {
    %c0_i32 = arith.constant 0 : i32
    %c0_i32_0 = arith.constant 0 : i32
    %c0_i32_1 = arith.constant 0 : i32
    return %arg0, %c0_i32, %c0_i32_0 : i32, i32, i32
  }
}

</mosaic_0001>

<bundles_post_ra>
// kernel: transformer_block.1
= control target key start
LH: loop header
LB: loop body
LE: loop exit
PB: predicated region body
PF: predicated region fallthrough
CT: control target
= control target key end

     0   :  { %12 = vsyncpa [#allocation3], 0  ;;  %s2132_s0 = inlined_call_operand.vmem [shape: f32[2,8,32], index: 0, kind: input, shape index: {}]   ;;  %s2133_s1 = inlined_call_operand.vmem [shape: f32[32,96], index: 1, kind: input, shape index: {}]   ;;  %s2134_s2 = inlined_call_operand.vmem [shape: f32[32,32], index: 2, kind: input, shape index: {}]   ;;  %s2135_s3 = inlined_call_operand.vmem [shape: f32[6,32], index: 3, kind: input, shape index: {}]   ;;  %s2136_s4 = inlined_call_operand.vmem [shape: f32[32,128], index: 4, kind: input, shape index: {}]   ;;  %s2137_s5 = inlined_call_operand.vmem [shape: f32[1,128], index: 5, kind: input, shape index: {}]   ;;  %s2138_s6 = inlined_call_operand.vmem [shape: f32[128,32], index: 6, kind: input, shape index: {}]   ;;  %s2139_s7 = inlined_call_operand.hbm [shape: f32[2,8,32], index: 7, kind: output, shape index: {}]  }
   0x1   :  { %14 = vsyncpa [#allocation3 + $0x1], 0  ;;  %s1814_s24 = smov 0   ;;  %s1816_s25 = smov 0  }
   0x2   :  { %s1818_s26 = smov 0   ;;  %s1820_s27 = smov 0  }
   0x3 LB: > { %s1835_s28 = sadd.s32 4294967295, %s1760_s27   ;;  %s1440_s29 = sadd.s32 4294967294, %s1760_s27   ;;  %s1760_s27 = sphi %s1820_s27, %s2145_s27   ;;  %s1756_s26 = sphi %s1818_s26, %s2144_s26   ;;  %s1752_s25 = sphi %s1816_s25, %s2143_s25   ;;  %s1748_s24 = sphi %s1814_s24, %s2142_s24  }
   0x4   : > { %s1839_s30 = sadd.s32 1, %s1760_s27   ;;  %s179_s8 = sadd.s32 1, %s1756_s26 }
   0x5   : > { %s176_s9 = ssub.s32 %s1760_s27, %s1839_s30  ;;  %p189_p0 = scmp.ne.s32.totalorder %s1756_s26, %s1752_s25 }
   0x6   : > { %p177_p1 = scmp.eq.s32.totalorder %s176_s9, 0  ;;  %p190_p2 = scmp.eq.s32.totalorder %s1835_s28, 1 }
   0x7   : > { %p195_p3 = scmp.ne.s32.totalorder %s1752_s25, %s1748_s24  ;;  %p196_p4 = scmp.eq.s32.totalorder %s1440_s29, 1 }
   0x8   : > { %s1850_s10 = scalar_select %p177_p1, %s1756_s26, %s179_s8  }
   0x9   : > { %p1852_p5 = por %p190_p2, %p189_p0  ;;  %p1856_p6 = por %p196_p4, %p195_p3 }
   0xa   : > { %p1443_p7 = scmp.ge.s32.totalorder %s1760_s27, 1  ;;  %p239_p8 = scmp.lt.s32.totalorder %s1760_s27, 3 }
   0xc   : > { %p240_p9 = pnand %p1443_p7, %p239_p8 }
   0xd   : > { %p270_p10 = scmp.lt.s32.totalorder (!%p240_p9), %s1835_s28, 1  ;;  %s1764_s16 = smov (!%p240_p9), 104  }
   0xe   : > { %243 = sbr.rel (%p240_p9) target bundleno = 2520 (0x9d8), region = 48  ;;  %s1766_s18 = smov (!%p240_p9), 112  }
   0xf   : > { %s1767_s19 = smov (!%p240_p9), 96   ;;  %s1769_s20 = smov (!%p240_p9), 64  }
  0x10   : > { %s1770_s15 = smov (!%p240_p9), 8   ;;  %s267_s29 = sand.u32 (!%p240_p9), 1, %s1752_s25  }
  0x11   : > { %s1444_s8 = sshll.u32 (!%p240_p9), %s267_s29, 3 }
  0x13   : > { %s271_s13 = scalar_select %p270_p10, %s1835_s28, 1  ;;  %vm281_vm0 = vcmask 261120   ;;  %v309_v7 = vld [vmem:[%s2133_s1 + $0x18] sm:$0xff]  ;;  %v1762_v8 = vmov 0.0   ;;  %v308_v9 = vld [vmem:[%s2133_s1 + $0x10] sm:$0xff]  ;;  %vm1763_vm1 = vmmov 0   ;;  %v397_v34 = vlaneseq }
  0x14   : > { %1520 = vmatprep.subr.mxu1 %v1762_v8  ;;  %1528 = vmatprep.mubr.msk.f32.mxu1 %vm1763_vm1, %v1762_v8  ;;  %v307_v10 = vld [vmem:[%s2133_s1 + $0x8] sm:$0xff]  ;;  %v306_v11 = vld [vmem:[%s2133_s1] sm:$0xff]  ;;  %vm405_vm2 = vcmask 64512   ;;  %v1768_v37 = vmov -1e+30   ;;  %vm1073_vm4 = vcmask 130048  }
  0x15   : > { %s1445_s14 = sshll.u32 %s271_s13, 3  ;;  %1521 = vmatpush3.msra.mxu1 %v309_v7  ;;  %1541 = vmatprep.subr.mxu0 %v1762_v8  ;;  %v1446_v16 = vld [vmem:[%s2135_s3] ss:$0 sm:$0xff]  ;;  %v1447_v18 = vld [vmem:[%s2135_s3 + $0x1] ss:$0 sm:$0xff]  ;;  %v398_v35 = vshrl.u32 %v397_v34, 7 }
  0x16   : > { %s273_s17 = scalar_lea.vmem %s2132_s0, %s1445_s14  ;;  %1522 = vmatprep.subr.mxu1 %v1762_v8  ;;  %1543 = vmatprep.mubr.msk.f32.mxu0 %vm1763_vm1, %v1762_v8  ;;  %v400_v36 = vand.u32 127, %v397_v34  ;;  %v1077_v34 = vld [vmem:[%s2134_s2] sm:$0xff]  ;;  %vm1075_vm5 = vcmask 195584   ;;  %s1469_s14 = sshll.u32 %s1835_s28, 7 }
  0x17   : > { %v1867_v0 = vld [vmem:[%s273_s17] sm:$0xff]  ;;  %1523 = vmatpush3.msra.mxu1 %v308_v9  ;;  %s1765_s17 = smov 120   ;;  %s1773_s28 = smov [#allocation2]  }
  0x18   : > { %v282_v1 = vsel %vm281_vm0, %v1867_v0, 0.0  ;;  %1524 = vmatprep.subr.mxu1 %v1762_v8  ;;  %vm401_vm3 = vcmp.le.s32.totalorder %v400_v36, %v398_v35  ;;  %s1704_s22 = sshll.u32 %s1773_s28, 4  ;;  %s1705_s22 = int_to_ptr.vmem [resolvable:$false] %s1704_s22 }
  0x19   : > { %283 = vadd.xlane.f32.xlu0 %v282_v1  ;;  %1525 = vmatpush3.msra.mxu1 %v307_v10  ;;  %v402_v38 = vsel %vm401_vm3, 0.0, %v1768_v37  ;;  %s1706_s23 = scalar_lea.vmem %s1705_s22, 256 }
  0x1a   : > { %1526 = vmatprep.subr.mxu1 %v1762_v8 }
  0x1b   : > { %1527 = vmatpush3.msra.mxu1 %v306_v11 }
  0x1c   : > { %1531 = vmatprep.subr.mxu1 %v1762_v8 }
  0xa2   : > { %v284_v2 = vpop.xlane.xlu0 %283 }
  0xa3   : > { %v286_v3 = vmul.f32 0.03125, %v284_v2 }
  0xa5   : > { %v287_v4 = vsub.f32 %v1867_v0, %v286_v3 }
  0xa7   : > { %v288_v5 = vmul.f32 %v287_v4, %v287_v4 }
  0xa9   : > { %v289_v6 = vsel %vm281_vm0, %v288_v5, 0.0 }
  0xaa   : > { %290 = vadd.xlane.f32.xlu0 %v289_v6 }
 0x133   : > { %v291_v12 = vpop.xlane.xlu0 %290 }
 0x134   : > { %v292_v13 = vmul.f32 0.03125, %v291_v12 }
 0x136   : > { %v293_v14 = vadd.f32 1e-05, %v292_v13 }
 0x138   : > { %1678 = vrsqrt.f32 %v293_v14 }
 0x145   : > { %v1679_v15 = vpop.eup %1678 }
 0x146   : > { %v295_v17 = vmul.f32 %v1679_v15, %v287_v4 }
 0x148   : > { %v300_v19 = vmul.f32 %v1446_v16, %v295_v17 }
 0x14a   : > { %v305_v20 = vadd.f32 %v1447_v18, %v300_v19 }
 0x14c   : > { %1529 = vmatmul.mubr.msk.f32.vlgmr.msra.gmra.mxu1 %vm281_vm0, %v305_v20 }
 0x14d   : > { %1533 = vmatprep.mubr.msk.f32.mxu1 %vm1763_vm1, %v1762_v8 }
 0x20c   : > { %v1904_v21 = vpop.f32.mrf.mxu1 }
 0x20d   : > { %390 = vrot.lane.b32.xlu0 %v1904_v21, %s1764_s16  ;;  %384 = vrot.lane.b32.xlu1 %v1904_v21, %s1765_s17  ;;  %v393_v27 = vmul.f32 0.35355338, %v1904_v21  ;;  %s1771_s16 = smov 16   ;;  %s1772_s17 = smov 24  }
 0x20e   : > { %v1530_v22 = vpop.f32.mrf.mxu1 }
 0x211   : > { %387 = vrot.lane.b32.xlu1 %v1904_v21, %s1766_s18 }
 0x215   : > { %403 = vrot.lane.b32.xlu1 %v1904_v21, %s1767_s19 }
 0x27f   : > { %v1910_v23 = vpop.permute.xlu1 %384  ;;  %v1916_v25 = vpop.permute.xlu0 %390 }
 0x280   : > { %481 = vrot.lane.b32.xlu1 %v1910_v23, %s1767_s19  ;;  %v394_v29 = vmul.f32 0.35355338, %v1910_v23  ;;  %v396_v33 = vmul.f32 0.35355338, %v1916_v25 }
 0x283   : > { %v1913_v24 = vpop.permute.xlu1 %387 }
 0x284   : > { %558 = vrot.lane.b32.xlu1 %v1913_v24, %s1767_s19  ;;  %v395_v31 = vmul.f32 0.35355338, %v1913_v24 }
 0x287   : > { %v404_v26 = vpop.permute.xlu1 %403 }
 0x288   : > { %635 = vrot.lane.b32.xlu1 %v1916_v25, %s1767_s19  ;;  %1532 = vmatpush3.xpose.msk.msra.mxu1 %vm405_vm2, %v404_v26  ;;  %s1379_s19 = scalar_lea.hbm %s2139_s7, %s1469_s14 }
 0x289   : > { %1536 = vmatprep.subr.mxu1 %v1762_v8 }
 0x28b   : > { %1534 = vmatmul.mubr.msk.f32.vlgmr.msra.gmra.mxu1 %vm405_vm2, %v393_v27 }
 0x28c   : > { %1538 = vmatprep.mubr.msk.f32.mxu1 %vm1763_vm1, %v1762_v8 }
 0x2f2   : > { %v482_v28 = vpop.permute.xlu1 %481 }
 0x2f3   : > { %1537 = vmatpush3.xpose.msk.msra.mxu1 %vm405_vm2, %v482_v28 }
 0x2f4   : > { %1546 = vmatprep.subr.mxu1 %v1762_v8 }
 0x2f6   : > { %v559_v30 = vpop.permute.xlu1 %558  ;;  %1539 = vmatmul.mubr.msk.f32.vlgmr.msra.gmra.mxu1 %vm405_vm2, %v394_v29 }
 0x2f7   : > { %1542 = vmatpush3.xpose.msk.msra.mxu0 %vm405_vm2, %v559_v30  ;;  %1548 = vmatprep.mubr.msk.f32.mxu1 %vm1763_vm1, %v1762_v8 }
 0x2f8   : > { %1551 = vmatprep.subr.mxu0 %v1762_v8 }
 0x2fa   : > { %1544 = vmatmul.mubr.msk.f32.vlgmr.msra.gmra.mxu0 %vm405_vm2, %v395_v31  ;;  %v636_v32 = vpop.permute.xlu1 %635  ;;  %v1080_v31 = vld [vmem:[%s2134_s2 + $0x18] sm:$0xff] }
 0x2fb   : > { %1547 = vmatpush3.xpose.msk.msra.mxu1 %vm405_vm2, %v636_v32  ;;  %1553 = vmatprep.mubr.msk.f32.mxu0 %vm1763_vm1, %v1762_v8  ;;  %v1079_v32 = vld [vmem:[%s2134_s2 + $0x10] sm:$0xff] }
 0x2fc   : > { %1556 = vmatprep.subr.mxu1 %v1762_v8 }
 0x2fe   : > { %1549 = vmatmul.mubr.msk.f32.vlgmr.msra.gmra.mxu1 %vm405_vm2, %v396_v33  ;;  %v1078_v33 = vld [vmem:[%s2134_s2 + $0x8] sm:$0xff] }
 0x2ff   : > { %1558 = vmatprep.mubr.msk.f32.mxu1 %vm1763_vm1, %v1762_v8 }
 0x34b   : > { %v477_v39 = vpop.f32.mrf.mxu1 }
 0x34c   : > { %v478_v40 = vadd.f32 %v477_v39, %v402_v38 }
 0x34d   : > { %v1535_v41 = vpop.f32.mrf.mxu1 }
 0x34e   : > { %v712_v42 = vsel %vm405_vm2, %v478_v40, -inf }
 0x34f   : > { %713 = vmax.xlane.f32.xlu1 %v712_v42 }
 0x3b6   : > { %v554_v43 = vpop.f32.mrf.mxu1 }
 0x3b7   : > { %v555_v44 = vadd.f32 %v554_v43, %v402_v38 }
 0x3b8   : > { %v1540_v45 = vpop.f32.mrf.mxu1 }
 0x3b9   : > { %v715_v46 = vsel %vm405_vm2, %v555_v44, -inf }
 0x3ba   : > { %v631_v47 = vpop.f32.mrf.mxu0  ;;  %716 = vmax.xlane.f32.xlu0 %v715_v46 }
 0x3bb   : > { %v632_v48 = vadd.f32 %v631_v47, %v402_v38  ;;  %v1461_v47 = vld [vmem:[%s2135_s3 + $0x4] ss:$0 sm:$0xff] }
 0x3bc   : > { %v1545_v49 = vpop.f32.mrf.mxu0 }
 0x3bd   : > { %v718_v50 = vsel %vm405_vm2, %v632_v48, -inf }
 0x3be   : > { %719 = vmax.xlane.f32.xlu1 %v718_v50  ;;  %v708_v51 = vpop.f32.mrf.mxu1 }
 0x3bf   : > { %v709_v52 = vadd.f32 %v708_v51, %v402_v38 }
 0x3c0   : > { %v1550_v53 = vpop.f32.mrf.mxu1 }
 0x3c1   : > { %v721_v54 = vsel %vm405_vm2, %v709_v52, -inf }
 0x3c2   : > { %722 = vmax.xlane.f32.xlu0 %v721_v54 }
 0x3cf   : > { %756 = vrot.lane.b32.xlu1 %v1904_v21, %s1769_s20 }
 0x3d8   : > { %v714_v55 = vpop.xlane.xlu1 %713 }
 0x3d9   : > { %v724_v56 = vsub.f32 %v478_v40, %v714_v55 }
 0x3db   : > { %v728_v57 = vmul.f32 1.442695, %v724_v56 }
 0x3dd   : > { %1680 = vpow2.f32 %v728_v57 }
 0x3ea   : > { %v1681_v58 = vpop.eup %1680 }
 0x3eb   : > { %v736_v59 = vsel %vm405_vm2, %v1681_v58, 0.0 }
 0x3f3   : > { %737 = vadd.xlane.f32.xlu1 %v736_v59  ;;  %v1183_v59 = vld [vmem:[%s2136_s4 + $0x8] sm:$0xff] }
 0x443   : > { %v717_v60 = vpop.xlane.xlu0 %716 }
 0x444   : > { %v725_v61 = vsub.f32 %v555_v44, %v717_v60  ;;  %v1182_v60 = vld [vmem:[%s2136_s4] sm:$0xff] }
 0x446   : > { %v730_v62 = vmul.f32 1.442695, %v725_v61 }
 0x447   : > { %v720_v63 = vpop.xlane.xlu1 %719 }
 0x448   : > { %1682 = vpow2.f32 %v730_v62  ;;  %v726_v1 = vsub.f32 %v632_v48, %v720_v63 }
 0x44a   : > { %v732_v2 = vmul.f32 1.442695, %v726_v1 }
 0x44b   : > { %v757_v3 = vpop.permute.xlu1 %756  ;;  %v723_v4 = vpop.xlane.xlu0 %722 }
 0x44c   : > { %1684 = vpow2.f32 %v732_v2  ;;  %v727_v5 = vsub.f32 %v709_v52, %v723_v4  ;;  %1552 = vmatpush3.msra.mxu0 %v757_v3  ;;  %v1463_v2 = vld [vmem:[%s2135_s3 + $0x2] ss:$0 sm:$0xff]  ;;  %v1464_v4 = vld [vmem:[%s2135_s3 + $0x3] ss:$0 sm:$0xff] }
 0x44d   : > { %1561 = vmatprep.subr.mxu0 %v1762_v8 }
 0x44e   : > { %v734_v6 = vmul.f32 1.442695, %v727_v5 }
 0x450   : > { %1686 = vpow2.f32 %v734_v6 }
 0x455   : > { %v1683_v7 = vpop.eup %1682 }
 0x456   : > { %v739_v9 = vsel %vm405_vm2, %v1683_v7, 0.0 }
 0x457   : > { %740 = vadd.xlane.f32.xlu0 %v739_v9  ;;  %v1289_v9 = vld [vmem:[%s2138_s6 + $0x70] sm:$0xff] }
 0x459   : > { %v1685_v10 = vpop.eup %1684 }
 0x45a   : > { %v742_v11 = vsel %vm405_vm2, %v1685_v10, 0.0 }
 0x45b   : > { %743 = vadd.xlane.f32.xlu1 %v742_v11  ;;  %v1287_v11 = vld [vmem:[%s2138_s6 + $0x60] sm:$0xff] }
 0x45d   : > { %v1687_v12 = vpop.eup %1686 }
 0x45e   : > { %v745_v13 = vsel %vm405_vm2, %v1687_v12, 0.0 }
 0x45f   : > { %746 = vadd.xlane.f32.xlu0 %v745_v13  ;;  %v1285_v13 = vld [vmem:[%s2138_s6 + $0x50] sm:$0xff] }
 0x46c   : > { %908 = vrot.lane.b32.xlu1 %v1913_v24, %s1769_s20 }
 0x470   : > { %984 = vrot.lane.b32.xlu1 %v1916_v25, %s1769_s20 }
 0x475   : > { %832 = vrot.lane.b32.xlu0 %v1910_v23, %s1769_s20  ;;  %s1368_s20 = scalar_lea.sflag [#allocation3], %s267_s29 }
 0x47c   : > { %v738_v14 = vpop.xlane.xlu1 %737 }
 0x47d   : > { %1688 = vrcp.f32 %v738_v14  ;;  %v1284_v14 = vld [vmem:[%s2138_s6 + $0x48] sm:$0xff] }
 0x48a   : > { %v1689_v15 = vpop.eup %1688 }
 0x48b   : > { %v749_v16 = vmul.f32 %v1689_v15, %v1681_v58  ;;  %v1185_v58 = vld [vmem:[%s2136_s4 + $0x18] sm:$0xff]  ;;  %v1283_v15 = vld [vmem:[%s2138_s6 + $0x40] sm:$0xff] }
 0x48d   : > { %1554 = vmatmul.mubr.msk.f32.vlgmr.msra.gmra.mxu0 %vm405_vm2, %v749_v16  ;;  %v1282_v16 = vld [vmem:[%s2138_s6 + $0x38] sm:$0xff] }
 0x48e   : > { %1563 = vmatprep.mubr.msk.f32.mxu0 %vm1763_vm1, %v1762_v8 }
 0x4e0   : > { %v741_v17 = vpop.xlane.xlu0 %740 }
 0x4e1   : > { %1690 = vrcp.f32 %v741_v17  ;;  %v1281_v17 = vld [vmem:[%s2138_s6 + $0x30] sm:$0xff] }
 0x4e4   : > { %v744_v18 = vpop.xlane.xlu1 %743 }
 0x4e5   : > { %1692 = vrcp.f32 %v744_v18  ;;  %v1280_v18 = vld [vmem:[%s2138_s6 + $0x28] sm:$0xff] }
 0x4e8   : > { %v909_v19 = vpop.permute.xlu1 %908  ;;  %v747_v20 = vpop.xlane.xlu0 %746 }
 0x4e9   : > { %1694 = vrcp.f32 %v747_v20  ;;  %1562 = vmatpush3.msra.mxu0 %v909_v19  ;;  %v1279_v19 = vld [vmem:[%s2138_s6 + $0x20] sm:$0xff]  ;;  %v1278_v20 = vld [vmem:[%s2138_s6 + $0x18] sm:$0xff] }
 0x4ea   : > { %1593 = vmatprep.subr.mxu0 %v1762_v8 }
 0x4ec   : > { %v833_v21 = vpop.permute.xlu0 %832  ;;  %v985_v24 = vpop.permute.xlu1 %984 }
 0x4ed   : > { %1557 = vmatpush3.msra.mxu1 %v833_v21  ;;  %v1277_v21 = vld [vmem:[%s2138_s6 + $0x10] sm:$0xff] }
 0x4ee   : > { %v1691_v22 = vpop.eup %1690  ;;  %1566 = vmatprep.subr.mxu1 %v1762_v8 }
 0x4ef   : > { %v751_v23 = vmul.f32 %v1691_v22, %v1683_v7  ;;  %v1290_v7 = vld [vmem:[%s2138_s6 + $0x78] sm:$0xff]  ;;  %v1276_v22 = vld [vmem:[%s2138_s6 + $0x8] sm:$0xff] }
 0x4f1   : > { %1559 = vmatmul.mubr.msk.f32.vlgmr.msra.gmra.mxu1 %vm405_vm2, %v751_v23  ;;  %v1275_v23 = vld [vmem:[%s2138_s6] sm:$0xff] }
 0x4f2   : > { %v1693_v25 = vpop.eup %1692  ;;  %1567 = vmatpush3.msra.mxu1 %v985_v24  ;;  %1568 = vmatprep.mubr.msk.f32.mxu1 %vm1763_vm1, %v1762_v8  ;;  %v1465_v24 = vld [vmem:[%s2137_s5] ss:$0 sm:$0xff] }
 0x4f3   : > { %v753_v26 = vmul.f32 %v1693_v25, %v1685_v10  ;;  %1571 = vmatprep.subr.mxu1 %v1762_v8  ;;  %v1288_v10 = vld [vmem:[%s2138_s6 + $0x68] sm:$0xff] }
 0x4f5   : > { %1564 = vmatmul.mubr.msk.f32.vlgmr.msra.gmra.mxu0 %vm405_vm2, %v753_v26 }
 0x4f6   : > { %v1695_v27 = vpop.eup %1694  ;;  %1625 = vmatprep.mubr.msk.f32.mxu0 %vm1763_vm1, %v1762_v8  ;;  %1594 = vmatpush3.msra.mxu0 %v1290_v7 }
 0x4f7   : > { %v755_v28 = vmul.f32 %v1695_v27, %v1687_v12  ;;  %1595 = vmatprep.subr.mxu0 %v1762_v8  ;;  %v1286_v12 = vld [vmem:[%s2138_s6 + $0x58] sm:$0xff] }
 0x4f8   : > { %1596 = vmatpush3.msra.mxu0 %v1289_v9 }
 0x4f9   : > { %1569 = vmatmul.mubr.msk.f32.vlgmr.msra.gmra.mxu1 %vm405_vm2, %v755_v28  ;;  %1597 = vmatprep.subr.mxu0 %v1762_v8 }
 0x4fa   : > { %1579 = vmatprep.mubr.msk.f32.mxu1 %vm1763_vm1, %v1762_v8  ;;  %1572 = vmatpush3.msra.mxu1 %v1080_v31 }
 0x4fb   : > { %1573 = vmatprep.subr.mxu1 %v1762_v8  ;;  %1598 = vmatpush3.msra.mxu0 %v1288_v10 }
 0x4fc   : > { %1574 = vmatpush3.msra.mxu1 %v1079_v32  ;;  %1599 = vmatprep.subr.mxu0 %v1762_v8 }
 0x4fd   : > { %1575 = vmatprep.subr.mxu1 %v1762_v8  ;;  %1600 = vmatpush3.msra.mxu0 %v1287_v11 }
 0x4fe   : > { %1576 = vmatpush3.msra.mxu1 %v1078_v33  ;;  %1601 = vmatprep.subr.mxu0 %v1762_v8 }
 0x4ff   : > { %1577 = vmatprep.subr.mxu1 %v1762_v8  ;;  %1602 = vmatpush3.msra.mxu0 %v1286_v12 }
 0x500   : > { %1578 = vmatpush3.msra.mxu1 %v1077_v34  ;;  %1603 = vmatprep.subr.mxu0 %v1762_v8 }
 0x501   : > { %1582 = vmatprep.subr.mxu1 %v1762_v8  ;;  %1604 = vmatpush3.msra.mxu0 %v1285_v13 }
 0x502   : > { %1605 = vmatprep.subr.mxu0 %v1762_v8 }
 0x503   : > { %1606 = vmatpush3.msra.mxu0 %v1284_v14 }
 0x504   : > { %1607 = vmatprep.subr.mxu0 %v1762_v8 }
 0x505   : > { %1608 = vmatpush3.msra.mxu0 %v1283_v15 }
 0x506   : > { %1609 = vmatprep.subr.mxu0 %v1762_v8 }
 0x507   : > { %1610 = vmatpush3.msra.mxu0 %v1282_v16 }
 0x508   : > { %1611 = vmatprep.subr.mxu0 %v1762_v8 }
 0x509   : > { %1612 = vmatpush3.msra.mxu0 %v1281_v17 }
 0x50a   : > { %1613 = vmatprep.subr.mxu0 %v1762_v8 }
 0x50b   : > { %1614 = vmatpush3.msra.mxu0 %v1280_v18 }
 0x50c   : > { %1615 = vmatprep.subr.mxu0 %v1762_v8 }
 0x50d   : > { %1616 = vmatpush3.msra.mxu0 %v1279_v19 }
 0x50e   : > { %1617 = vmatprep.subr.mxu0 %v1762_v8 }
 0x50f   : > { %1618 = vmatpush3.msra.mxu0 %v1278_v20 }
 0x510   : > { %1619 = vmatprep.subr.mxu0 %v1762_v8 }
 0x511   : > { %1620 = vmatpush3.msra.mxu0 %v1277_v21 }
 0x512   : > { %1621 = vmatprep.subr.mxu0 %v1762_v8 }
 0x513   : > { %1622 = vmatpush3.msra.mxu0 %v1276_v22 }
 0x514   : > { %1623 = vmatprep.subr.mxu0 %v1762_v8 }
 0x515   : > { %1624 = vmatpush3.msra.mxu0 %v1275_v23 }
 0x54d   : > { %v828_v29 = vpop.f32.mrf.mxu0 }
 0x54f   : > { %v1555_v30 = vpop.f32.mrf.mxu0 }
 0x5b1   : > { %v904_v35 = vpop.f32.mrf.mxu1 }
 0x5b2   : > { %1061 = vrot.lane.b32.xlu0 %v904_v35, %s1770_s15  ;;  %s269_s15 = scalar_lea.vmem [#allocation2], %s1444_s8 }
 0x5b3   : > { %v1560_v36 = vpop.f32.mrf.mxu1 }
 0x5b4   : > { %v1467_v36 = vld [vmem:[%s2135_s3 + $0x5] ss:$0 sm:$0xff] }
 0x5b5   : > { %v980_v37 = vpop.f32.mrf.mxu0 }
 0x5b6   : > { %1065 = vrot.lane.b32.xlu1 %v980_v37, %s1771_s16  ;;  %s1381_s16 = sshll.u32 %s269_s15, 4  ;;  %s1382_s16 = int_to_ptr.vmem [resolvable:$true] %s1381_s16 }
 0x5b7   : > { %v1565_v38 = vpop.f32.mrf.mxu0  ;;  %s1700_s21 = scalar_lea.vmem %s1382_s16, 128  ;;  %p1707_p0 = scmp.lt.s32.totalorder %s1382_s16, %s1705_s22 }
 0x5b8   : > { %p1701_p11 = scmp.ne.s32.totalorder %s1382_s16, %s1700_s21  ;;  %p1708_p1 = scmp.lt.s32.totalorder %s1706_s23, %s1700_s21 }
 0x5b9   : > { %v1056_v39 = vpop.f32.mrf.mxu1 }
 0x5ba   : > { %1069 = vrot.lane.b32.xlu0 %v1056_v39, %s1772_s17  ;;  %p1702_p12 = pnand %p1701_p11, %p1852_p5  ;;  %p1709_p2 = por %p1708_p1, %p1707_p0 }
 0x5bb   : > { %v1570_v40 = vpop.f32.mrf.mxu1 }
 0x5bc   : > { %p1703_p13 = pneg %p1702_p12 }
 0x5be   : > { %p1710_p3 = pnand %p1709_p2, %p1703_p13 }
 0x624   : > { %v1062_v41 = vpop.permute.xlu0 %1061 }
 0x625   : > { %v1072_v43 = vsel %vm405_vm2, %v828_v29, %v1062_v41 }
 0x628   : > { %v1066_v42 = vpop.permute.xlu1 %1065 }
 0x629   : > { %v1074_v44 = vsel %vm1073_vm4, %v1072_v43, %v1066_v42 }
 0x62c   : > { %v1070_v45 = vpop.permute.xlu0 %1069 }
 0x62d   : > { %v1076_v46 = vsel %vm1075_vm5, %v1074_v44, %v1070_v45 }
 0x62e   : > { %1580 = vmatmul.mubr.msk.f32.vlgmr.msra.gmra.mxu1 %vm281_vm0, %v1076_v46 }
 0x62f   : > { %1590 = vmatprep.mubr.msk.f32.mxu1 %vm1763_vm1, %v1762_v8  ;;  %1583 = vmatpush3.msra.mxu1 %v1185_v58 }
 0x630   : > { %1584 = vmatprep.subr.mxu1 %v1762_v8 }
 0x6ee   : > { %v1154_v48 = vpop.f32.mrf.mxu1 }
 0x6ef   : > { %v1155_v49 = vadd.f32 %v1461_v47, %v1154_v48 }
 0x6f0   : > { %v1581_v50 = vpop.f32.mrf.mxu1 }
 0x6f1   : > { %v1999_v51 = vadd.f32 %v1155_v49, %v1867_v0  ;;  %v1184_v0 = vld [vmem:[%s2136_s4 + $0x10] sm:$0xff] }
 0x6f2   : > { %1585 = vmatpush3.msra.mxu1 %v1184_v0 }
 0x6f3   : > { %v1159_v52 = vsel %vm281_vm0, %v1999_v51, 0.0  ;;  %1586 = vmatprep.subr.mxu1 %v1762_v8 }
 0x6f4   : > { %1160 = vadd.xlane.f32.xlu1 %v1159_v52  ;;  %1587 = vmatpush3.msra.mxu1 %v1183_v59 }
 0x6f5   : > { %1588 = vmatprep.subr.mxu1 %v1762_v8 }
 0x6f6   : > { %1589 = vmatpush3.msra.mxu1 %v1182_v60 }
 0x77d   : > { %v1161_v53 = vpop.xlane.xlu1 %1160 }
 0x77e   : > { %v1162_v54 = vmul.f32 0.03125, %v1161_v53 }
 0x780   : > { %v1163_v55 = vsub.f32 %v1999_v51, %v1162_v54 }
 0x782   : > { %v1164_v56 = vmul.f32 %v1163_v55, %v1163_v55 }
 0x784   : > { %v1165_v57 = vsel %vm281_vm0, %v1164_v56, 0.0 }
 0x785   : > { %1166 = vadd.xlane.f32.xlu0 %v1165_v57 }
 0x80e   : > { %v1167_v61 = vpop.xlane.xlu0 %1166 }
 0x80f   : > { %v1168_v62 = vmul.f32 0.03125, %v1167_v61 }
 0x811   : > { %v1169_v63 = vadd.f32 1e-05, %v1168_v62 }
 0x813   : > { %1696 = vrsqrt.f32 %v1169_v63 }
 0x820   : > { %v1697_v1 = vpop.eup %1696 }
 0x821   : > { %v1171_v3 = vmul.f32 %v1697_v1, %v1163_v55 }
 0x823   : > { %v1176_v5 = vmul.f32 %v1463_v2, %v1171_v3 }
 0x825   : > { %v1181_v6 = vadd.f32 %v1464_v4, %v1176_v5 }
 0x827   : > { %1591 = vmatmul.mubr.msk.f32.vlgmr.msra.gmra.mxu1 %vm281_vm0, %v1181_v6 }
 0x8e7   : > { %v1262_v25 = vpop.f32.mrf.mxu1 }
 0x8e8   : > { %v1263_v26 = vadd.f32 %v1465_v24, %v1262_v25 }
 0x8e9   : > { %v1592_v27 = vpop.f32.mrf.mxu1 }
 0x8ea   : > { %v1267_v28 = vmul.f32 %v1263_v26, %v1263_v26  ;;  %v1266_v34 = vmul.f32 0.5, %v1263_v26 }
 0x8ec   : > { %v1268_v29 = vmul.f32 %v1267_v28, %v1263_v26 }
 0x8ee   : > { %v1269_v30 = vmul.f32 0.044715, %v1268_v29 }
 0x8f0   : > { %v1270_v31 = vadd.f32 %v1269_v30, %v1263_v26 }
 0x8f2   : > { %v1271_v32 = vmul.f32 0.7978845, %v1270_v31 }
 0x8f4   : > { %1698 = vtanh.f32 %v1271_v32 }
 0x901   : > { %v1699_v33 = vpop.eup %1698 }
 0x902   : > { %v1273_v35 = vadd.f32 1.0, %v1699_v33 }
 0x904   : > { %v1274_v8 = vmul.f32 %v1273_v35, %v1266_v34 }
 0x906   : > { %1626 = vmatmul.mubr.f32.vlgmr.msra.gmra.mxu0 %v1274_v8 }
 0x9c6   : > { %v1361_v37 = vpop.f32.mrf.mxu0 }
 0x9c7   : > { %v1362_v38 = vadd.f32 %v1467_v36, %v1361_v37 }
 0x9c8   : > { %v1627_v39 = vpop.f32.mrf.mxu0 }
 0x9c9   : > { %v1365_v40 = vadd.f32 %v1362_v38, %v1999_v51 }
 0x9cb   : > { %1366 = vst.msk [vmem:[%s269_s15] sm:$0xff] %vm281_vm0, %v1365_v40 }
 0x9cc   : > { %1713 = shalt.err (!%p1710_p3)
}
 0x9cd   : > { %s1714_s8 = scalar_lea.hbm %s1379_s19, 128  ;;  %s1718_s13 = scalar_lea.hbm %s2139_s7, 256 }
 0x9ce   : > { %p1715_p4 = scmp.ne.s32.totalorder %s1379_s19, %s1714_s8  ;;  %p1719_p9 = scmp.lt.s32.totalorder %s1379_s19, %s2139_s7 }
 0x9cf   : > { %p1720_p10 = scmp.lt.s32.totalorder %s1718_s13, %s1714_s8 }
 0x9d0   : > { %p1716_p7 = pnand %p1715_p4, %p1852_p5 }
 0x9d1   : > { %p1721_p11 = por %p1720_p10, %p1719_p9 }
 0x9d2   : > { %p1717_p8 = pneg %p1716_p7 }
 0x9d4   : > { %p1722_p12 = pnand %p1721_p11, %p1717_p8 }
 0x9d6   : > { %1725 = shalt.err (!%p1722_p12)
}
 0x9d7   : > { %1628 = dma.vmem_to_hbm [thread:$0]  (%p1852_p5), %s1382_s16, 128, %s1379_s19, %s1368_s20  }
 0x9d8 PF: > { %p1634_p13 = scmp.ge.s32.totalorder %s1760_s27, 2  ;;  %s1393_s17 = sand.u32 1, %s1748_s24  }
 0x9d9   : > { %s1394_s18 = scalar_lea.sflag [#allocation3], %s1393_s17 }
 0x9da   : > { %p1631_p0 = pnand %p1634_p13, %p1856_p6 }
 0x9dc   : > { %p1632_p1 = pneg %p1631_p0 }
 0x9de   : > { %1743 = dma.done.wait (%p1632_p1), %s1394_s18, 128  }
 0x9df   : > { %1745 = vsyncadd (%p1632_p1), %s1394_s18, 4294967168  ;;  %p17_p2 = scmp.ge.s32.totalorder %s1839_s30, 4   ;;  %s2142_s24 = smov %s1752_s25 }
 0x9e0   : > { %s2143_s25 = smov %s1756_s26  ;;  %s2144_s26 = smov %s1850_s10 }
 0x9e1   : > { %s2145_s27 = smov %s1839_s30  ;;  %19 = sbr.rel (!%p17_p2) target bundleno = 3 (0x3), region = 83 }
 0x9e6   :  { %1399 = vsyncpa [#allocation3], 1 }
 0x9e7   :  { %1401 = vsyncpa [#allocation3 + $0x1], 1 }

</bundles_post_ra>
